<compile_context>
chip_gen: v7x
topology: tpu7x:2x2x1
jax: 0.10.0
libtpu: 0.0.40
codegen_flags: <defaults>
</compile_context>

<pallas_src>
from functools import partial

import jax
import jax.numpy as jnp
from jax import lax
from jax.experimental import pallas as pl
from jax.experimental.pallas import tpu as pltpu


MXU_DTYPE = jnp.bfloat16   # dot operands only; accumulation / epilogues stay f32


def _round_up(x, m):
    return (x + m - 1) // m * m


def _is_v5e():
    try:
        return "v5" in jax.devices()[0].device_kind.lower()
    except Exception:  # pragma: no cover - defensive
        return False


_IS_V5E = _is_v5e()
# v5e MXU is 4x128x128 (vs 2x256x256 on v6e/v7x) -> smaller tiles there.
_COL_TILE_BIG = 128 if _IS_V5E else 256
_RED_TILE_MAX = 256 if _IS_V5E else 512


# ----------------------------------------------------------------------------
# Tiling heuristics
# ----------------------------------------------------------------------------

def _pad_rows(N):
    # Pad the batch once: sublane multiple for small batches, row-tile
    # multiple for large ones. Sliced off with [:N] at the end.
    return _round_up(N, 8) if N <= 512 else _round_up(N, 256)


def _row_tile(Np):
    # Bigger row tiles amortize the ~0.35 us per-grid-step overhead and feed
    # more LHS rows per MXU pass (measured ~85% of HBM roofline at 512 rows).
    if Np <= 512:
        return Np
    return 512 if Np % 512 == 0 else 256


def _col_tile(D):
    # Split output columns so the grid has >= 2 "parallel" steps even when the
    # padded batch is a single row tile -> both v7x TensorCores get work.
    if D <= 128 or D % 128 != 0:
        return D
    if D <= 512:
        return 128
    return _COL_TILE_BIG if D % _COL_TILE_BIG == 0 else 128


def _red_tile(D):
    # Tile the contraction dim so weight blocks stay bounded in VMEM at large D.
    if D > _RED_TILE_MAX and D % _RED_TILE_MAX == 0:
        return _RED_TILE_MAX
    return D


def _vmem_limit(block_bytes):
    # Raise the default scoped-VMEM limit (16 MiB v5e / 32 MiB v6e,v7x) when
    # tiles grow; clamp to 64 MiB so we never exceed v7x physical VMEM.
    need = 2 * block_bytes + (4 << 20)
    return int(min(max(need, 32 << 20), 64 << 20))


# ----------------------------------------------------------------------------
# Pallas kernels (matmul / elementwise hot path)
# ----------------------------------------------------------------------------

def _linear_nobias_kernel(x_ref, wt_ref, o_ref, acc_ref):
    kk = pl.program_id(2)

    @pl.when(kk == 0)
    def _():
        acc_ref[...] = jnp.zeros_like(acc_ref)

    acc_ref[...] += lax.dot_general(
        x_ref[...].astype(MXU_DTYPE), wt_ref[...],
        dimension_numbers=(((1,), (0,)), ((), ())),
        preferred_element_type=jnp.float32)

    @pl.when(kk == pl.num_programs(2) - 1)
    def _():
        o_ref[...] = acc_ref[...]


def _make_res_relu_kernel(h):
    # h = 1/L is known at trace time -> closed over (no SMEM operand / DMA).
    # The dot operand x-tile (i, kk) and the residual x-tile (i, j) are
    # distinct blocks once the output columns are split, so x is passed twice
    # with different BlockSpecs (xres_ref).
    def kernel(x_ref, wt_ref, b_ref, xres_ref, o_ref, acc_ref):
        kk = pl.program_id(2)

        @pl.when(kk == 0)
        def _():
            acc_ref[...] = jnp.zeros_like(acc_ref)

        acc_ref[...] += lax.dot_general(
            x_ref[...].astype(MXU_DTYPE), wt_ref[...],
            dimension_numbers=(((1,), (0,)), ((), ())),
            preferred_element_type=jnp.float32)

        @pl.when(kk == pl.num_programs(2) - 1)
        def _():
            y = acc_ref[...] + b_ref[...]
            o_ref[...] = xres_ref[...] + h * jnp.maximum(y, 0.0)   # f32 epilogue
    return kernel


def _make_classifier_kernel(K):
    # Weight/bias are zero-padded to KP (=128) lanes; softmax is masked to the
    # first K columns so padding never changes the result (K >= 1 guarantees a
    # finite row max -> no NaN from the -inf padding lanes).
    def kernel(x_ref, wt_ref, b_ref, logits_ref, probs_ref, acc_ref):
        kk = pl.program_id(1)

        @pl.when(kk == 0)
        def _():
            acc_ref[...] = jnp.zeros_like(acc_ref)

        acc_ref[...] += lax.dot_general(
            x_ref[...].astype(MXU_DTYPE), wt_ref[...],
            dimension_numbers=(((1,), (0,)), ((), ())),
            preferred_element_type=jnp.float32)

        @pl.when(kk == pl.num_programs(1) - 1)
        def _():
            logits = acc_ref[...] + b_ref[...]
            logits_ref[...] = logits
            col = lax.broadcasted_iota(jnp.int32, logits.shape, 1)
            valid = col < K
            masked = jnp.where(valid, logits, -jnp.inf)
            m = jnp.max(masked, axis=1, keepdims=True)
            e = jnp.where(valid, jnp.exp(masked - m), 0.0)
            # approx reciprocal lowers to the otherwise-idle EUP vrcp slot.
            probs_ref[...] = e * pl.reciprocal(
                jnp.sum(e, axis=1, keepdims=True), approx=True)
    return kernel


# ----------------------------------------------------------------------------
# pallas_call wrappers
# ----------------------------------------------------------------------------

def linear_nobias(x, wt):
    Np, D = x.shape
    bn, bj, bk = _row_tile(Np), _col_tile(D), _red_tile(D)
    blk_bytes = bn * bk * 4 + bk * bj * 2 + bn * bj * 4 + bn * bj * 4
    return pl.pallas_call(
        _linear_nobias_kernel,
        out_shape=jax.ShapeDtypeStruct((Np, D), jnp.float32),
        grid=(Np // bn, D // bj, D // bk),
        in_specs=[pl.BlockSpec((bn, bk), lambda i, j, kk: (i, kk)),   # x (dot)
                  pl.BlockSpec((bk, bj), lambda i, j, kk: (kk, j))],  # W.T tile
        out_specs=pl.BlockSpec((bn, bj), lambda i, j, kk: (i, j)),
        scratch_shapes=[pltpu.VMEM((bn, bj), jnp.float32)],
        compiler_params=pltpu.CompilerParams(
            dimension_semantics=("parallel", "parallel", "arbitrary"),
            vmem_limit_bytes=_vmem_limit(blk_bytes)),
        cost_estimate=pl.CostEstimate(
            flops=2 * Np * D * D, transcendentals=0,
            bytes_accessed=2 * Np * D * 4 + D * D * 2),
    )(x, wt)


def residual_relu_layer(x, wt, b2d, h):
    Np, D = x.shape
    bn, bj, bk = _row_tile(Np), _col_tile(D), _red_tile(D)
    blk_bytes = bn * bk * 4 + bk * bj * 2 + bj * 4 + 2 * bn * bj * 4 + bn * bj * 4
    return pl.pallas_call(
        _make_res_relu_kernel(h),
        out_shape=jax.ShapeDtypeStruct((Np, D), jnp.float32),
        grid=(Np // bn, D // bj, D // bk),
        in_specs=[pl.BlockSpec((bn, bk), lambda i, j, kk: (i, kk)),   # x (dot)
                  pl.BlockSpec((bk, bj), lambda i, j, kk: (kk, j)),   # W.T tile
                  pl.BlockSpec((1, bj),  lambda i, j, kk: (0, j)),    # bias
                  pl.BlockSpec((bn, bj), lambda i, j, kk: (i, j))],   # x (residual)
        out_specs=pl.BlockSpec((bn, bj), lambda i, j, kk: (i, j)),
        scratch_shapes=[pltpu.VMEM((bn, bj), jnp.float32)],
        compiler_params=pltpu.CompilerParams(
            dimension_semantics=("parallel", "parallel", "arbitrary"),
            vmem_limit_bytes=_vmem_limit(blk_bytes)),
        cost_estimate=pl.CostEstimate(
            flops=2 * Np * D * D + 3 * Np * D, transcendentals=0,
            bytes_accessed=3 * Np * D * 4 + D * D * 2 + D * 4),
    )(x, wt, b2d, x)


def classifier_softmax(x, wct_p, bc_p, K):
    Np, D = x.shape
    KP = wct_p.shape[1]
    bn, bk = _row_tile(Np), _red_tile(D)
    blk_bytes = bn * bk * 4 + bk * KP * 2 + KP * 4 + 3 * bn * KP * 4
    logits, probs = pl.pallas_call(
        _make_classifier_kernel(K),
        out_shape=(jax.ShapeDtypeStruct((Np, KP), jnp.float32),
                   jax.ShapeDtypeStruct((Np, KP), jnp.float32)),
        grid=(Np // bn, D // bk),
        in_specs=[pl.BlockSpec((bn, bk), lambda i, kk: (i, kk)),
                  pl.BlockSpec((bk, KP), lambda i, kk: (kk, 0)),
                  pl.BlockSpec((1, KP),  lambda i, kk: (0, 0))],
        out_specs=(pl.BlockSpec((bn, KP), lambda i, kk: (i, 0)),
                   pl.BlockSpec((bn, KP), lambda i, kk: (i, 0))),
        scratch_shapes=[pltpu.VMEM((bn, KP), jnp.float32)],
        compiler_params=pltpu.CompilerParams(
            dimension_semantics=("parallel", "arbitrary"),
            vmem_limit_bytes=_vmem_limit(blk_bytes)),
        cost_estimate=pl.CostEstimate(
            flops=2 * Np * D * KP, transcendentals=Np * KP,
            bytes_accessed=Np * D * 4 + D * KP * 2 + 2 * Np * KP * 4),
    )(x, wct_p, bc_p)
    return logits[:, :K], probs[:, :K]


# ----------------------------------------------------------------------------
# Plain-JAX glue: rank-k SVD truncation between layers
# ----------------------------------------------------------------------------

@partial(jax.jit, static_argnames=("d", "k"))
def svd_truncate(X, d, k):
    # TODO(synk): per-sample SVD has no Pallas/Mosaic equivalent; it stays in
    # plain JAX (XLA) - only the low-rank reconstruction is batched matmul.
    N = X.shape[0]
    Xm = X.reshape(N, d, d)
    u, s, vh = jnp.linalg.svd(Xm, full_matrices=False)
    rec = jnp.einsum('nik,nk,nkj->nij', u[:, :, :k], s[:, :k], vh[:, :k, :])
    return rec.reshape(N, d * d)


# ----------------------------------------------------------------------------
# One-time parameter prep (hoisted out of the forward pass)
# ----------------------------------------------------------------------------

def prepare_params(params):
    """Transpose to (in, out), cast to bf16, lane-pad classifier - once."""
    D = params['W0'].shape[0]
    K = params['bc'].shape[0]
    KP = _round_up(K, 128)                     # lane-dense classifier output
    return {
        'h': float(params['h']),               # trace-time constant
        'W0t': params['W0'].T.astype(MXU_DTYPE),
        'Wts': [w.T.astype(MXU_DTYPE) for w in params['W']],
        'bs': [b.reshape(1, D).astype(jnp.float32) for b in params['b']],
        'Wct': jnp.pad(params['Wc'].T.astype(MXU_DTYPE), ((0, 0), (0, KP - K))),
        'bc': jnp.pad(params['bc'].astype(jnp.float32), (0, KP - K)).reshape(1, KP),
        'K': K,
        'D': D,
    }


# ----------------------------------------------------------------------------
# Full forward pass
# ----------------------------------------------------------------------------

def svd_resnet_forward(X, prepped, *, d, k, L):
    N = X.shape[0]
    D = d * d
    X = X.reshape(N, D).astype(jnp.float32)
    h = prepped['h']
    K = prepped['K']

    # Pad the batch once to an MXU/sublane-friendly row count; slice at the end.
    Np = _pad_rows(N)
    if Np != N:
        X = jnp.pad(X, ((0, Np - N), (0, 0)))

    feats = []
    # layer 0: bias-free input layer
    X = linear_nobias(X, prepped['W0t'])
    X = svd_truncate(X, d, k)
    feats.append(X)
    # layers 1..L: residual Euler steps
    for i in range(L):
        X = residual_relu_layer(X, prepped['Wts'][i], prepped['bs'][i], h)
        X = svd_truncate(X, d, k)
        feats.append(X)

    X_transformed = jnp.stack(feats, axis=-1)[:N]   # (N, D, L+1)

    # classifier + softmax: exactly one Pallas call
    logits, probs = classifier_softmax(X, prepped['Wct'], prepped['bc'], K)
    X_classified = logits[:N]
    X_predicted = probs[:N]
    return [X_predicted, X_classified, X_transformed]


# ----------------------------------------------------------------------------
# Deterministic parameter construction (torch-style (out, in) weight layout)
# ----------------------------------------------------------------------------

def init_params(key, *, d, L, K):
    D = d * d
    keys = jax.random.split(key, 2 * L + 3)
    scale = 1.0 / jnp.sqrt(D)
    params = {
        'h': jnp.float32(1.0 / L),
        'W0': scale * jax.random.normal(keys[0], (D, D), jnp.float32),
        'W': [scale * jax.random.normal(keys[1 + i], (D, D), jnp.float32)
              for i in range(L)],
        'b': [scale * jax.random.normal(keys[1 + L + i], (D,), jnp.float32)
              for i in range(L)],
        'Wc': scale * jax.random.normal(keys[2 * L + 1], (K, D), jnp.float32),
        'bc': scale * jax.random.normal(keys[2 * L + 2], (K,), jnp.float32),
    }
    return params


if __name__ == "__main__":
    # small shapes: batch=2, image d=16 -> image_dimension=256, k=4, L=3, K=10
    d, k, L, K, N = 16, 4, 3, 10, 2
    D = d * d

    key = jax.random.PRNGKey(0)
    k_in, k_par = jax.random.split(key)
    # data_object.all_data[0] layout: (batch, n_matrices=1, image_dimension)
    X = jax.random.normal(k_in, (N, 1, D), jnp.float32)
    params = init_params(k_par, d=d, L=L, K=K)
    prepped = prepare_params(params)   # one-time transpose / bf16 cast / pad

    X_predicted, X_classified, X_transformed = svd_resnet_forward(
        X, prepped, d=d, k=k, L=L)
    jax.block_until_ready((X_predicted, X_classified, X_transformed))

    assert X_predicted.shape == (N, K)
    assert X_classified.shape == (N, K)
    assert X_transformed.shape == (N, D, L + 1)
    assert bool(jnp.all(jnp.isfinite(X_predicted)))
    print("KERNEL_OK")
</pallas_src>

<mosaic_0001>
module attributes {stable_mosaic.version = 11 : i64} {
  func.func @_linear_nobias_kernel(%arg0: i32, %arg1: i32, %arg2: i32, %arg3: memref<8x256xf32, #tpu.memory_space<vmem>>, %arg4: memref<256x128xbf16, #tpu.memory_space<vmem>>, %arg5: memref<8x128xf32, #tpu.memory_space<vmem>>, %arg6: memref<8x128xf32, #tpu.memory_space<vmem>>) attributes {dimension_semantics = [#tpu.dimension_semantics<parallel>, #tpu.dimension_semantics<parallel>, #tpu.dimension_semantics<arbitrary>], iteration_bounds = array<i64: 1, 2, 1>, scalar_prefetch = 0 : i64, scratch_operands = 1 : i64, tpu.core_type = #tpu.core_type<tc>, window_params = [{transform_indices = @transform_0, window_bounds = array<i64: 8, 256>}, {transform_indices = @transform_1, window_bounds = array<i64: 256, 128>}, {transform_indices = @transform_2, window_bounds = array<i64: 8, 128>}]} {
    %c0_i32 = arith.constant 0 : i32
    %0 = arith.cmpi eq, %arg2, %c0_i32 : i32
    %1 = arith.extui %0 : i1 to i32
    %c0_i32_0 = arith.constant 0 : i32
    %2 = arith.cmpi ne, %1, %c0_i32_0 : i32
    scf.if %2 {
      %cst_10 = arith.constant 0.000000e+00 : f32
      %13 = vector.broadcast %cst_10 : f32 to vector<8x128xf32>
      %c0_11 = arith.constant 0 : index
      %c0_12 = arith.constant 0 : index
      %14 = vector.load %arg6[%c0_11, %c0_12] : memref<8x128xf32, #tpu.memory_space<vmem>>, vector<8x128xf32>
      tpu.vector_store %arg6[%c0_11, %c0_12], %13 {strides = array<i32>} : memref<8x128xf32, #tpu.memory_space<vmem>>, vector<8x128xf32>,
    } else {
    }
    %c0 = arith.constant 0 : index
    %c0_1 = arith.constant 0 : index
    %3 = vector.load %arg6[%c0, %c0_1] : memref<8x128xf32, #tpu.memory_space<vmem>>, vector<8x128xf32>
    %c0_2 = arith.constant 0 : index
    %c0_3 = arith.constant 0 : index
    %4 = vector.load %arg3[%c0_2, %c0_3] : memref<8x256xf32, #tpu.memory_space<vmem>>, vector<8x256xf32>
    %5 = arith.truncf %4 : vector<8x256xf32> to vector<8x256xbf16>
    %c0_4 = arith.constant 0 : index
    %c0_5 = arith.constant 0 : index
    %6 = vector.load %arg4[%c0_4, %c0_5] : memref<256x128xbf16, #tpu.memory_space<vmem>>, vector<256x128xbf16>
    %cst = arith.constant dense<0.000000e+00> : vector<8x128xf32>
    %7 = tpu.matmul %5, %6, %cst {dimension_numbers = #tpu.dot_dimension_numbers<[1], [0], [0], [1], [0, 0, 1, 1], [], []>} : vector<8x256xbf16>, vector<256x128xbf16>, vector<8x128xf32> -> vector<8x128xf32>
    %8 = arith.addf %3, %7 : vector<8x128xf32>
    %c0_6 = arith.constant 0 : index
    %c0_7 = arith.constant 0 : index
    %9 = vector.load %arg6[%c0_6, %c0_7] : memref<8x128xf32, #tpu.memory_space<vmem>>, vector<8x128xf32>
    tpu.vector_store %arg6[%c0_6, %c0_7], %8 {strides = array<i32>} : memref<8x128xf32, #tpu.memory_space<vmem>>, vector<8x128xf32>,
    %c0_i32_8 = arith.constant 0 : i32
    %10 = arith.cmpi eq, %arg2, %c0_i32_8 : i32
    %11 = arith.extui %10 : i1 to i32
    %c0_i32_9 = arith.constant 0 : i32
    %12 = arith.cmpi ne, %11, %c0_i32_9 : i32
    scf.if %12 {
      %c0_10 = arith.constant 0 : index
      %c0_11 = arith.constant 0 : index
      %13 = vector.load %arg6[%c0_10, %c0_11] : memref<8x128xf32, #tpu.memory_space<vmem>>, vector<8x128xf32>
      %c0_12 = arith.constant 0 : index
      %c0_13 = arith.constant 0 : index
      %14 = vector.load %arg5[%c0_12, %c0_13] : memref<8x128xf32, #tpu.memory_space<vmem>>, vector<8x128xf32>
      tpu.vector_store %arg5[%c0_12, %c0_13], %13 {strides = array<i32>} : memref<8x128xf32, #tpu.memory_space<vmem>>, vector<8x128xf32>,
    } else {
    }
    return
  }
  func.func @transform_0(%arg0: i32, %arg1: i32, %arg2: i32) -> (i32, i32) {
    %c0_i32 = arith.constant 0 : i32
    return %arg0, %arg2 : i32, i32
  }
  func.func @transform_1(%arg0: i32, %arg1: i32, %arg2: i32) -> (i32, i32) {
    %c0_i32 = arith.constant 0 : i32
    return %arg2, %arg1 : i32, i32
  }
  func.func @transform_2(%arg0: i32, %arg1: i32, %arg2: i32) -> (i32, i32) {
    %c0_i32 = arith.constant 0 : i32
    return %arg0, %arg1 : i32, i32
  }
}

</mosaic_0001>

<bundles_post_ra>
// kernel: tpu_custom_call.1
= control target key start
LH: loop header
LB: loop body
LE: loop exit
PB: predicated region body
PF: predicated region fallthrough
CT: control target
= control target key end

     0   :  { %7 = vsyncpa [#allocation4], 0  ;;  %s1068_s0 = inlined_call_operand.hbm [shape: f32[8,256], index: 0, kind: input, shape index: {}]   ;;  %s1069_s1 = inlined_call_operand.hbm [shape: bf16[256,256], index: 1, kind: input, shape index: {}]   ;;  %s1070_s2 = inlined_call_operand.hbm [shape: f32[8,256], index: 2, kind: output, shape index: {}]  }
   0x1   :  { %8 = vsyncpa [#allocation7], 0 }
   0x2   :  { %10 = vsyncpa [#allocation7 + $0x1], 0 }
   0x3   :  { %11 = vsyncpa [#allocation5], 0 }
   0x4   :  { %13 = vsyncpa [#allocation5 + $0x1], 0  ;;  %s830_s9 = smov 0   ;;  %s832_s10 = smov 0  }
   0x5   :  { %s834_s11 = smov 0   ;;  %s836_s12 = smov 0  }
   0x6   :  { %s838_s13 = smov 0   ;;  %s840_s14 = smov 0  }
   0x7 LB: > { %s518_s15 = sadd.s32 4294967295, %s807_s14   ;;  %s519_s16 = sadd.s32 4294967294, %s807_s14   ;;  %s807_s14 = sphi %s840_s14, %s19_s14   ;;  %s803_s13 = sphi %s838_s13, %s1098_s13   ;;  %s799_s12 = sphi %s836_s12, %s1097_s12   ;;  %s795_s11 = sphi %s834_s11, %s1096_s11   ;;  %s791_s10 = sphi %s832_s10, %s1095_s10   ;;  %s787_s9 = sphi %s830_s9, %s1094_s9  }
   0x8   : > { %s75_s17 = sadd.s32 1, %s795_s11  ;;  %p82_p0 = scmp.ne.s32.totalorder %s795_s11, %s791_s10 }
   0x9   : > { %p83_p1 = scmp.eq.s32.totalorder %s807_s14, 0  ;;  %p88_p2 = scmp.ne.s32.totalorder %s791_s10, %s787_s9 }
   0xa   : > { %p868_p3 = scmp.eq.s32.totalorder %s518_s15, 0  ;;  %p114_p4 = scmp.eq.s32.totalorder %s518_s15, 1 }
   0xb   : > { %p872_p5 = por %p83_p1, %p82_p0  ;;  %p120_p6 = scmp.eq.s32.totalorder %s519_s16, 1 }
   0xc   : > { %s1077_s18 = scalar_select %p868_p3, 1, 0 }
   0xd   : > { %p878_p7 = por %p868_p3, %p88_p2  ;;  %p882_p8 = por %p114_p4, %p82_p0 }
   0xe   : > { %p886_p9 = por %p120_p6, %p88_p2  ;;  %p520_p10 = scmp.ge.s32.totalorder %s807_s14, 1 }
   0xf   : > { %s1079_s20 = scalar_select %p878_p7, 1, 0 }
  0x10   : > { %s1080_s21 = scalar_select %p882_p8, 1, 0 }
  0x11   : > { %s1081_s22 = scalar_select %p886_p9, 1, 0 }
  0x12   : > { %p127_p11 = scmp.lt.s32.totalorder %s807_s14, 3  ;;  %s809_s24 = smov [#allocation3]  }
  0x13   : > { %s145_s25 = sshll.u32 %s809_s24, 4  ;;  %p592_p1 = scmp.lt.s32.totalorder %s807_s14, 2  ;;  %s146_s25 = int_to_ptr.vmem [resolvable:$true] %s145_s25 }
  0x14   : > { %p893_p13 = pnand %p520_p10, %p127_p11  ;;  %s34_s28 = sadd.s32 1, %s803_s13 }
  0x15   : > { %p902_p4 = pnand %p592_p1, %p872_p5  ;;  %p913_p6 = scmp.ge.s32.totalorder %s34_s28, 2 }
  0x16   : > { %s1082_s23 = scalar_select %p893_p13, 1, 0 }
  0x17   : > { %p579_p0 = pneg %p893_p13  ;;  %s156_s30 = sand.u32 1, %s795_s11  }
  0x18   : > { %s1083_s26 = scalar_select %p902_p4, 1, 0 }
  0x19   : > { %p908_p2 = pnand %p579_p0, %p868_p3  ;;  %s663_s5 = scalar_lea.hbm %s1068_s0, 256 }
  0x1a   : > { %s1085_s29 = scalar_select %p913_p6, 1, 0 }
  0x1b   : > { %p664_p5 = scmp.ne.s32.totalorder %s1068_s0, %s663_s5  ;;  %p665_p10 = pneg %p908_p2 }
  0x1c   : > { %p670_p0 = scmp.lt.u32.totalorder %s663_s5, %s1068_s0 }
  0x1d   : > { %p666_p11 = pnand %p665_p10, %p664_p5 }
  0x1f   : > { %p667_p1 = pneg %p666_p11 }
  0x21   : > { %p672_p12 = pnand %p670_p0, %p667_p1 }
  0x23   : > { %675 = shalt.err (!%p672_p12)
}
  0x24   : > { %s676_s16 = scalar_lea.vmem %s146_s25, 256  ;;  %p684_p3 = scmp.lt.s32.totalorder %s146_s25, %s146_s25 }
  0x25   : > { %p677_p9 = scmp.ne.s32.totalorder %s146_s25, %s676_s16  ;;  %p685_p13 = scmp.lt.s32.totalorder %s676_s16, %s676_s16 }
  0x27   : > { %p679_p8 = pnand %p677_p9, %p665_p10  ;;  %p686_p4 = por %p685_p13, %p684_p3 }
  0x29   : > { %p680_p7 = pneg %p679_p8 }
  0x2b   : > { %p687_p6 = pnand %p686_p4, %p680_p7 }
  0x2d   : > { %690 = shalt.err (!%p687_p6)
}
  0x2e   : > { %582 = dma.hbm_to_vmem [thread:$0]  (!%p908_p2), %s1068_s0, 256, %s146_s25, [#allocation4]  }
  0x2f   : > { %p1086_p9 = scmp.ne.s32.totalorder %s1085_s29, 0  ;;  %s523_s3 = sshll.u32 %s156_s30, 7 }
  0x30   : > { %s524_s5 = sshll.u32 %s803_s13, 6  ;;  %s160_s8 = scalar_lea.vmem [#allocation6], %s523_s3 }
  0x31   : > { %s1100_s28 = smov (%p1086_p9, %s34_s28), 0  ;;  %s944_s7 = scalar_lea.hbm %s1069_s1, %s524_s5 }
  0x32   : > { %s71_s4 = ssub.s32 %s803_s13, %s1100_s28  ;;  %s169_s15 = sshll.u32 %s160_s8, 4  ;;  %s951_s15 = int_to_ptr.vmem [resolvable:$true] %s169_s15 }
  0x33   : > { %p73_p3 = scmp.eq.s32.totalorder %s71_s4, 0  ;;  %s953_s29 = scalar_lea.sflag [#allocation7], %s156_s30 }
  0x34   : > { %s691_s16 = scalar_lea.hbm %s944_s7, 2048  ;;  %p1087_p8 = scmp.ne.s32.totalorder %s1083_s26, 0 }
  0x35   : > { %s949_s25 = scalar_select %p73_p3, %s795_s11, %s75_s17  }
  0x36   : > { %p692_p7 = scmp.ne.s32.totalorder %s944_s7, %s691_s16  ;;  %p693_p12 = pneg %p1087_p8 }
  0x37   : > { %s696_s3 = scalar_lea.hbm %s1069_s1, 4096  ;;  %p697_p2 = scmp.lt.u32.totalorder %s944_s7, %s1069_s1 }
  0x38   : > { %p694_p13 = pnand %p693_p12, %p692_p7  ;;  %p698_p6 = scmp.lt.u32.totalorder %s696_s3, %s691_s16 }
  0x39   : > { %p700_p10 = scmp.lt.u32.totalorder %s691_s16, %s944_s7 }
  0x3a   : > { %p695_p4 = pneg %p694_p13  ;;  %p699_p5 = por %p698_p6, %p697_p2 }
  0x3c   : > { %p701_p11 = por %p700_p10, %p699_p5 }
  0x3e   : > { %p702_p1 = pnand %p701_p11, %p695_p4 }
  0x40   : > { %705 = shalt.err (!%p702_p1)
}
  0x41   : > { %s706_s17 = scalar_lea.vmem %s951_s15, 2048  ;;  %s810_s30 = smov [#allocation6]  }
  0x42   : > { %p707_p0 = scmp.ne.s32.totalorder %s951_s15, %s706_s17  ;;  %s711_s27 = sshll.u32 %s810_s30, 4  ;;  %s712_s27 = int_to_ptr.vmem [resolvable:$false] %s711_s27 }
  0x43   : > { %s713_s6 = scalar_lea.vmem %s712_s27, 4096  ;;  %p714_p7 = scmp.lt.s32.totalorder %s951_s15, %s712_s27 }
  0x44   : > { %p709_p9 = pnand %p707_p0, %p693_p12  ;;  %p715_p13 = scmp.lt.s32.totalorder %s713_s6, %s706_s17 }
  0x46   : > { %p710_p3 = pneg %p709_p9  ;;  %p716_p2 = por %p715_p13, %p714_p7 }
  0x48   : > { %p717_p6 = pnand %p716_p2, %p710_p3 }
  0x4a   : > { %720 = shalt.err (!%p717_p6)
}
  0x4b   : > { %s811_s8 = smov 128   ;;  %s812_s16 = smov 64  }
  0x4c   : > { %s813_s19 = smov 4   ;;  %p1088_p12 = scmp.ne.s32.totalorder %s1082_s23, 0 }
  0x4d   : > { %586 = dma.hbm_to_vmem [thread:$0]  (!%p1087_p8), %s944_s7, 2048, %s951_s15, %s953_s29, %s811_s8, %s812_s16, %s813_s19  }
  0x4e   : > { %181 = sbr.rel (%p1088_p12) target bundleno = 352 (0x160), region = 28  ;;  %p1089_p4 = scmp.ne.s32.totalorder (!%p1088_p12), %s1077_s18, 0 }
  0x55   : > { %774 = dma.done.wait (%p1089_p4), [#allocation4], 256  }
  0x56   : > { %776 = vsyncadd (%p1089_p4), [#allocation4], 4294967040  ;;  %s988_s24 = sand.u32 1, %s791_s10   ;;  %p1090_p8 = scmp.ne.s32.totalorder %s1079_s20, 0 }
  0x57   : > { %s527_s3 = sshll.u32 %s988_s24, 7  ;;  %s188_s4 = scalar_lea.sflag [#allocation7], %s988_s24 }
  0x58   : > { %s992_s5 = scalar_lea.vmem [#allocation6], %s527_s3 }
  0x59   : > { %778 = dma.done.wait (%p1090_p8), %s188_s4, 2048  }
  0x5a   : > { %780 = vsyncadd (%p1090_p8), %s188_s4, 4294965248  ;;  %v647_v0 = vld [vmem:[%s992_s5 + $0x40] sm:$0xff]   ;;  %v649_v2 = vld [vmem:[%s992_s5 + $0x48] sm:$0xff]   ;;  %s528_s18 = sshll.u32 %s988_s24, 3  ;;  %s546_s20 = sshll.u32 %s799_s12, 7 }
  0x5b   : > { %v648_v1 = vld [vmem:[%s992_s5] sm:$0xff]   ;;  %549 = vmatprep.subr.bf16.mxu0 %v647_v0  ;;  %v650_v3 = vld [vmem:[%s992_s5 + $0x8] sm:$0xff]   ;;  %v651_v4 = vld [vmem:[%s992_s5 + $0x50] sm:$0xff]   ;;  %s211_s23 = scalar_lea.vmem [#allocation8], %s528_s18  ;;  %s1019_s29 = scalar_lea.hbm %s1070_s2, %s546_s20 }
  0x5c   : > { %550 = vmatpush3.bf16.msra.mxu0 %v648_v1  ;;  %v652_v5 = vld [vmem:[%s992_s5 + $0x10] sm:$0xff]   ;;  %v653_v6 = vld [vmem:[%s992_s5 + $0x58] sm:$0xff]   ;;  %v655_v8 = vld [vmem:[%s992_s5 + $0x60] sm:$0xff]   ;;  %s416_s26 = sshll.u32 %s211_s23, 4  ;;  %s401_s17 = scalar_lea.sflag [#allocation5], %s988_s24  ;;  %s1021_s26 = int_to_ptr.vmem [resolvable:$true] %s416_s26 }
  0x5d   : > { %551 = vmatprep.subr.bf16.mxu0 %v649_v2  ;;  %v654_v7 = vld [vmem:[%s992_s5 + $0x18] sm:$0xff]   ;;  %v656_v9 = vld [vmem:[%s992_s5 + $0x20] sm:$0xff]   ;;  %v657_v10 = vld [vmem:[%s992_s5 + $0x68] sm:$0xff]   ;;  %s721_s12 = scalar_lea.vmem %s1021_s26, 128  ;;  %p1091_p10 = scmp.ne.s32.totalorder %s1080_s21, 0 }
  0x5e   : > { %v222_v11 = vld [vmem:[#allocation3 + $0x8] sm:$0xff]  ;;  %v658_v13 = vld [vmem:[%s992_s5 + $0x28] sm:$0xff]   ;;  %v659_v14 = vld [vmem:[%s992_s5 + $0x70] sm:$0xff]   ;;  %p722_p5 = scmp.ne.s32.totalorder %s1021_s26, %s721_s12  ;;  %s814_s30 = smov [#allocation8]  }
  0x5f   : > { %v224_v12 = vpack.c.bf16 %v222_v11, %v222_v11  ;;  %v660_v15 = vld [vmem:[%s992_s5 + $0x30] sm:$0xff]   ;;  %v661_v16 = vld [vmem:[%s992_s5 + $0x78] sm:$0xff]   ;;  %s725_s27 = sshll.u32 %s814_s30, 4  ;;  %s726_s27 = int_to_ptr.vmem [resolvable:$false] %s725_s27 }
  0x60   : > { %552 = vmatpush3.bf16.msra.mxu0 %v650_v3  ;;  %v662_v17 = vld [vmem:[%s992_s5 + $0x38] sm:$0xff]   ;;  %v221_v18 = vld [vmem:[#allocation3] sm:$0xff]  ;;  %p723_p11 = pnand %p722_p5, %p1091_p10  ;;  %s727_s6 = scalar_lea.vmem %s726_s27, 256 }
  0x61   : > { %553 = vmatprep.subr.bf16.mxu0 %v651_v4  ;;  %385 = vmatprep.mubr.bf16.mxu0 %v224_v12  ;;  %v223_v19 = vpack.c.bf16 %v221_v18, %v221_v18  ;;  %p728_p0 = scmp.lt.s32.totalorder %s1021_s26, %s726_s27  ;;  %p729_p9 = scmp.lt.s32.totalorder %s727_s6, %s721_s12 }
  0x62   : > { %p724_p1 = pneg %p723_p11 }
  0x63   : > { %p730_p3 = por %p729_p9, %p728_p0 }
  0x64   : > { %554 = vmatpush3.bf16.msra.mxu0 %v652_v5 }
  0x65   : > { %555 = vmatprep.subr.bf16.mxu0 %v653_v6  ;;  %p731_p7 = pnand %p730_p3, %p724_p1 }
  0x68   : > { %556 = vmatpush3.bf16.msra.mxu0 %v654_v7 }
  0x69   : > { %557 = vmatprep.subr.bf16.mxu0 %v655_v8 }
  0x6c   : > { %558 = vmatpush3.bf16.msra.mxu0 %v656_v9 }
  0x6d   : > { %559 = vmatprep.subr.bf16.mxu0 %v657_v10 }
  0x70   : > { %560 = vmatpush3.bf16.msra.mxu0 %v658_v13 }
  0x71   : > { %561 = vmatprep.subr.bf16.mxu0 %v659_v14 }
  0x74   : > { %562 = vmatpush3.bf16.msra.mxu0 %v660_v15 }
  0x75   : > { %563 = vmatprep.subr.bf16.mxu0 %v661_v16 }
  0x78   : > { %564 = vmatpush3.bf16.msra.mxu0 %v662_v17 }
  0x7b   : > { %386 = vmatmul.mubr.bf16.vlgmr.msra.gmra.mrb[0].mxu0 %v223_v19 }
 0x14e   : > { %v565_v20 = vpop.f32.mrb[0].mxu0 }
 0x14f   : > { %v566_v21 = vpop.f32.mrb[1].mxu0 }
 0x150   : > { %v567_v22 = vadd.f32 %v566_v21, %v565_v20  ;;  %v568_v23 = vpop.f32.mrb[2].mxu0 }
 0x151   : > { %v569_v24 = vpop.f32.mrb[3].mxu0 }
 0x152   : > { %399 = vst [vmem:[%s211_s23] sm:$0xff] %v567_v22 }
 0x153   : > { %734 = shalt.err (!%p731_p7)
}
 0x154   : > { %s735_s8 = scalar_lea.hbm %s1019_s29, 128  ;;  %s739_s24 = scalar_lea.hbm %s1070_s2, 256 }
 0x155   : > { %p736_p13 = scmp.ne.s32.totalorder %s1019_s29, %s735_s8  ;;  %p740_p12 = scmp.lt.u32.totalorder %s1019_s29, %s1070_s2 }
 0x156   : > { %p741_p4 = scmp.lt.u32.totalorder %s739_s24, %s735_s8  ;;  %p743_p5 = scmp.lt.u32.totalorder %s735_s8, %s1019_s29 }
 0x157   : > { %p737_p2 = pnand %p736_p13, %p1091_p10 }
 0x158   : > { %p742_p8 = por %p741_p4, %p740_p12 }
 0x159   : > { %p738_p6 = pneg %p737_p2 }
 0x15a   : > { %p744_p11 = por %p743_p5, %p742_p8 }
 0x15c   : > { %p745_p1 = pnand %p744_p11, %p738_p6 }
 0x15e   : > { %748 = shalt.err (!%p745_p1)
}
 0x15f   : > { %577 = dma.vmem_to_hbm [thread:$0]  (%p1091_p10), %s1021_s26, 128, %s1019_s29, %s401_s17  }
 0x160 PF: > { %s428_s5 = sand.u32 1, %s787_s9   ;;  %p1092_p0 = scmp.ne.s32.totalorder %s1081_s22, 0 }
 0x161   : > { %p1093_p9 = scmp.ge.s32.totalorder %s807_s14, 2  ;;  %s429_s18 = scalar_lea.sflag [#allocation5], %s428_s5 }
 0x163   : > { %p588_p3 = pnand %p1093_p9, %p1092_p0 }
 0x165   : > { %782 = dma.done.wait (!%p588_p3), %s429_s18, 128  }
 0x166   : > { %784 = vsyncadd (!%p588_p3), %s429_s18, 4294967168  ;;  %s19_s14 = sadd.s32 1, %s807_s14   ;;  %s1094_s9 = smov %s791_s10 }
 0x167   : > { %p16_p7 = scmp.ge.s32.totalorder %s19_s14, 4   ;;  %s1095_s10 = smov %s795_s11 }
 0x168   : > { %s1096_s11 = smov %s949_s25  ;;  %s1097_s12 = smov %s803_s13 }
 0x169   : > { %s1098_s13 = smov %s1100_s28  ;;  %18 = sbr.rel (!%p16_p7) target bundleno = 7 (0x7), region = 87 }
 0x170   :  { %434 = vsyncpa [#allocation4], 1 }
 0x171   :  { %436 = vsyncpa [#allocation4 + $0x1], 1 }
 0x172   :  { %437 = vsyncpa [#allocation7], 1 }
 0x173   :  { %439 = vsyncpa [#allocation7 + $0x1], 1 }
 0x174   :  { %440 = vsyncpa [#allocation5], 1 }
 0x175   :  { %442 = vsyncpa [#allocation5 + $0x1], 1 }

</bundles_post_ra>
